<compile_context>
chip_gen: v6e
topology: v6e:2x2x1
jax: 0.10.0
libtpu: 0.0.40
codegen_flags: <defaults>
</compile_context>

<pallas_src>
import functools

import jax
import jax.numpy as jnp
from jax.experimental import pallas as pl
from jax.experimental.pallas import tpu as pltpu


def _cdiv(a, b):
    return (a + b - 1) // b


def _choose_tiles(B, L, d, itemsize, tile_bytes):
    """Pick (tb, nb, tl, nl, td, nd) for the projection kernel."""
    # batch tile: full batch if < 8 (block dim == full dim), else 8 sublanes
    tb = B if B < 8 else 8
    nb = _cdiv(B, tb)

    # token tile (lane axis of the output): multiple of 128 unless a single
    # full-L block is used.  The byte budget also shrinks tl when d is large.
    tl_fit = (tile_bytes // (tb * d * itemsize)) // 128 * 128
    tl_fit = max(128, min(tl_fit, 4096))
    want_l_split = (nb == 1 and L >= 256)  # keep v7x's 2nd TensorCore busy
    if L <= tl_fit and not want_l_split:
        tl = L                              # one full-L block (any L allowed)
    else:
        tl = min(tl_fit, max(128, (L // 128) * 128))
        if want_l_split:
            half = _cdiv(L, 2)
            tl = min(tl, max(128, _cdiv(half, 128) * 128))
    nl = _cdiv(L, tl)

    # feature tile: keep full d unless one full-d tile would blow the budget
    # (large-d VMEM guard -> adds a reduction grid axis).
    td_fit = (tile_bytes // (tb * tl * itemsize)) // 128 * 128
    if d <= 128 or d <= td_fit:
        td = d
    else:
        td = max(128, td_fit)
    nd = _cdiv(d, td)
    return tb, nb, tl, nl, td, nd


def _make_projection_kernel(d_total, td, need_d_mask):
    """p[b, l] = sum_d z[b, l, d] * w[d], accumulated over the d grid axis."""

    def kernel(z_ref, w_ref, out_ref):
        k = pl.program_id(2)

        @pl.when(k == 0)
        def _():
            out_ref[...] = jnp.zeros_like(out_ref)

        z = z_ref[...].astype(jnp.float32)        # (tb, tl, td); cast in-kernel
        w = w_ref[...].astype(jnp.float32)        # (1, td)
        prod = z * w[:, None, :]                  # broadcast over (tb, tl)
        if need_d_mask:
            # ragged last d-block: zero the out-of-range feature columns so
            # unspecified padding never reaches the valid accumulation.
            idx = k * td + jax.lax.broadcasted_iota(jnp.int32, prod.shape, 2)
            prod = jnp.where(idx < d_total, prod, 0.0)
        out_ref[...] += jnp.sum(prod, axis=-1)    # f32 accumulation

    return kernel


@functools.partial(jax.jit, static_argnames=("tile_bytes",))
def gating_probs_pallas(z, weight, bias, tile_bytes=4 * 1024 * 1024):
    """z: (B, L, d) any float dtype; weight: (1, d); bias: (1,).

    Returns the (B, L-1) boundary probabilities sigmoid(fc(z[l+1]-z[l]))."""
    B, L, d = z.shape
    itemsize = jnp.dtype(z.dtype).itemsize
    tb, nb, tl, nl, td, nd = _choose_tiles(B, L, d, itemsize, tile_bytes)

    w_row = weight.astype(jnp.float32).reshape(1, d)

    proj = pl.pallas_call(
        _make_projection_kernel(d, td, d % td != 0),
        out_shape=jax.ShapeDtypeStruct((B, L), jnp.float32),
        grid_spec=pltpu.PrefetchScalarGridSpec(
            num_scalar_prefetch=0,
            grid=(nb, nl, nd),
            in_specs=[
                pl.BlockSpec((tb, tl, td), lambda i, j, k: (i, j, k)),
                pl.BlockSpec((1, td), lambda i, j, k: (0, k)),
            ],
            out_specs=pl.BlockSpec((tb, tl), lambda i, j, k: (i, j)),
        ),
        compiler_params=pltpu.CompilerParams(
            dimension_semantics=("parallel", "parallel", "arbitrary"),
            vmem_limit_bytes=32 * 1024 * 1024,
        ),
    )(z, w_row)

    # Tiny epilogue (traffic ~ 1/d of the main pass): shift-by-one diff along
    # L, bias, sigmoid.  Plain jnp so XLA fuses it -- avoids the transposes
    # and extra pallas_call launch of the previous version.
    return jax.nn.sigmoid(proj[:, 1:] - proj[:, :-1] + bias.astype(jnp.float32)[0])


def dynamic_segmentation_gating(z, weight, bias, threshold=0.5):
    """Forward pass matching DynamicSegmentationGating.forward.

    Returns (segments, gating_probs): `segments` is a list of length B, each a
    list of (seg_len, d) slices of z covering that batch row; `gating_probs`
    is the (B, L-1) boundary-probability matrix."""
    B, L, d = z.shape
    if L <= 1:
        # Degenerate case: one full-sequence segment per batch row (kept
        # structurally consistent with the normal path).
        return [[z[b]] for b in range(B)], jnp.zeros((B, 0), jnp.float32)
    probs = gating_probs_pallas(z, weight, bias)     # (B, L-1), on device
    # TODO(synk): the ragged, data-dependent per-batch segmentation (variable
    # number of variable-length slices) has no static-shape Pallas equivalent;
    # only the tiny (B, L-1) probability matrix is copied to host to drive it.
    probs_host = jax.device_get(probs)
    segments = []
    for b in range(B):
        single = []
        start = 0
        for i in range(L - 1):
            if probs_host[b, i] > threshold:
                single.append(z[b, start:i + 1, :])
                start = i + 1
        single.append(z[b, start:L, :])
        segments.append(single)
    return segments, probs


def _probs_reference(z, weight, bias):
    deltas = z[:, 1:, :] - z[:, :-1, :]
    scores = jnp.sum(deltas * weight[0][None, None, :], axis=-1) + bias[0]
    return jax.nn.sigmoid(scores)


if __name__ == "__main__":
    threshold = 0.5
    key = jax.random.PRNGKey(0)

    # --- 1) small demo shape (batch=2, seq=8, d_in=32), full forward --------
    B, L, d_in = 2, 8, 32
    kz, kw, kb, key = jax.random.split(key, 4)
    z = jax.random.normal(kz, (B, L, d_in), dtype=jnp.float32)
    bound = 1.0 / (d_in ** 0.5)
    weight = jax.random.uniform(kw, (1, d_in), jnp.float32, -bound, bound)
    bias = jax.random.uniform(kb, (1,), jnp.float32, -bound, bound)

    segments, probs = dynamic_segmentation_gating(z, weight, bias, threshold)
    probs = jax.block_until_ready(probs)
    assert probs.shape == (B, L - 1)
    assert jnp.allclose(probs, _probs_reference(z, weight, bias),
                        atol=1e-5, rtol=1e-5)
    for b in range(B):
        assert sum(int(s.shape[0]) for s in segments[b]) == L

    # bf16 input path: native-dtype DMA, cast happens inside the kernel.
    z_bf16 = z.astype(jnp.bfloat16)
    probs_bf = jax.block_until_ready(gating_probs_pallas(z_bf16, weight, bias))
    ref_bf = _probs_reference(z_bf16.astype(jnp.float32), weight, bias)
    assert jnp.allclose(probs_bf, ref_bf, atol=1e-4, rtol=1e-4)

    # --- 2) multi-tile grid with ragged last L block (B=16, L=1200, d=64) ---
    B2, L2, d2 = 16, 1200, 64
    kz2, kw2, kb2, key = jax.random.split(key, 4)
    z2 = jax.random.normal(kz2, (B2, L2, d2), dtype=jnp.float32)
    bound2 = 1.0 / (d2 ** 0.5)
    weight2 = jax.random.uniform(kw2, (1, d2), jnp.float32, -bound2, bound2)
    bias2 = jax.random.uniform(kb2, (1,), jnp.float32, -bound2, bound2)
    probs2 = jax.block_until_ready(
        gating_probs_pallas(z2, weight2, bias2, tile_bytes=1 * 1024 * 1024))
    assert jnp.allclose(probs2, _probs_reference(z2, weight2, bias2),
                        atol=1e-5, rtol=1e-5)

    # --- 3) forced d-split path (reduction grid axis + ragged d mask) -------
    B3, L3, d3 = 4, 512, 320
    kz3, kw3, kb3, key = jax.random.split(key, 4)
    z3 = jax.random.normal(kz3, (B3, L3, d3), dtype=jnp.float32)
    bound3 = 1.0 / (d3 ** 0.5)
    weight3 = jax.random.uniform(kw3, (1, d3), jnp.float32, -bound3, bound3)
    bias3 = jax.random.uniform(kb3, (1,), jnp.float32, -bound3, bound3)
    probs3 = jax.block_until_ready(
        gating_probs_pallas(z3, weight3, bias3, tile_bytes=256 * 1024))
    assert jnp.allclose(probs3, _probs_reference(z3, weight3, bias3),
                        atol=1e-5, rtol=1e-5)

    print("KERNEL_OK")
</pallas_src>

<mosaic_0001>
module attributes {stable_mosaic.version = 11 : i64} {
  func.func @kernel(%arg0: i32, %arg1: i32, %arg2: i32, %arg3: memref<2x8x32xf32, #tpu.memory_space<vmem>>, %arg4: memref<1x32xf32, #tpu.memory_space<vmem>>, %arg5: memref<2x8xf32, #tpu.memory_space<vmem>>) attributes {dimension_semantics = [#tpu.dimension_semantics<parallel>, #tpu.dimension_semantics<parallel>, #tpu.dimension_semantics<arbitrary>], iteration_bounds = array<i64: 1, 1, 1>, scalar_prefetch = 0 : i64, scratch_operands = 0 : i64, tpu.core_type = #tpu.core_type<tc>, window_params = [{transform_indices = @transform_0, window_bounds = array<i64: 2, 8, 32>}, {transform_indices = @transform_1, window_bounds = array<i64: 1, 32>}, {transform_indices = @transform_2, window_bounds = array<i64: 2, 8>}]} {
    %c0_i32 = arith.constant 0 : i32
    %0 = arith.cmpi eq, %arg2, %c0_i32 : i32
    %1 = arith.extui %0 : i1 to i32
    %c0_i32_0 = arith.constant 0 : i32
    %2 = arith.cmpi ne, %1, %c0_i32_0 : i32
    scf.if %2 {
      %cst_9 = arith.constant 0.000000e+00 : f32
      %12 = vector.broadcast %cst_9 : f32 to vector<2x8xf32>
      %c0_10 = arith.constant 0 : index
      %c0_11 = arith.constant 0 : index
      %13 = vector.load %arg5[%c0_10, %c0_11] : memref<2x8xf32, #tpu.memory_space<vmem>>, vector<2x8xf32>
      tpu.vector_store %arg5[%c0_10, %c0_11], %12 {strides = array<i32>} : memref<2x8xf32, #tpu.memory_space<vmem>>, vector<2x8xf32>,
    } else {
    }
    %c0 = arith.constant 0 : index
    %c0_1 = arith.constant 0 : index
    %c0_2 = arith.constant 0 : index
    %3 = vector.load %arg3[%c0, %c0_1, %c0_2] : memref<2x8x32xf32, #tpu.memory_space<vmem>>, vector<2x8x32xf32>
    %c0_3 = arith.constant 0 : index
    %c0_4 = arith.constant 0 : index
    %4 = vector.load %arg4[%c0_3, %c0_4] : memref<1x32xf32, #tpu.memory_space<vmem>>, vector<1x32xf32>
    %5 = vector.shape_cast %4 : vector<1x32xf32> to vector<1x1x32xf32>
    %6 = vector.broadcast %5 : vector<1x1x32xf32> to vector<2x8x32xf32>
    %7 = arith.mulf %3, %6 : vector<2x8x32xf32>
    %c0_5 = arith.constant 0 : index
    %c0_6 = arith.constant 0 : index
    %8 = vector.load %arg5[%c0_5, %c0_6] : memref<2x8xf32, #tpu.memory_space<vmem>>, vector<2x8xf32>
    %cst = arith.constant dense<0.000000e+00> : vector<2x8xf32>
    %9 = vector.multi_reduction <add>, %7, %cst [2] : vector<2x8x32xf32> to vector<2x8xf32>
    %10 = arith.addf %8, %9 : vector<2x8xf32>
    %c0_7 = arith.constant 0 : index
    %c0_8 = arith.constant 0 : index
    %11 = vector.load %arg5[%c0_7, %c0_8] : memref<2x8xf32, #tpu.memory_space<vmem>>, vector<2x8xf32>
    tpu.vector_store %arg5[%c0_7, %c0_8], %10 {strides = array<i32>} : memref<2x8xf32, #tpu.memory_space<vmem>>, vector<2x8xf32>,
    return
  }
  func.func @transform_0(%arg0: i32, %arg1: i32, %arg2: i32) -> (i32, i32, i32) {
    %c0_i32 = arith.constant 0 : i32
    return %arg0, %arg1, %arg2 : i32, i32, i32
  }
  func.func @transform_1(%arg0: i32, %arg1: i32, %arg2: i32) -> (i32, i32) {
    %c0_i32 = arith.constant 0 : i32
    %c0_i32_0 = arith.constant 0 : i32
    return %c0_i32, %arg2 : i32, i32
  }
  func.func @transform_2(%arg0: i32, %arg1: i32, %arg2: i32) -> (i32, i32) {
    %c0_i32 = arith.constant 0 : i32
    return %arg0, %arg1 : i32, i32
  }
}

</mosaic_0001>

<bundles_post_ra>
// kernel: gating_probs_pallas.1
= control target key start
LH: loop header
LB: loop body
LE: loop exit
PB: predicated region body
PF: predicated region fallthrough
CT: control target
= control target key end

     0   :  { %7 = vsyncpa [#allocation3], 0  ;;  %s100_s9 = smov [#allocation2]   ;;  %s136_s0 = inlined_call_operand.hbm [shape: f32[2,8,32], index: 0, kind: input, shape index: {}]   ;;  %s137_s1 = inlined_call_operand.vmem [shape: f32[1,32], index: 1, kind: input, shape index: {}]   ;;  %s138_s2 = inlined_call_operand.vmem [shape: f32[2,8], index: 2, kind: output, shape index: {}]  }
   0x1   :  { %s13_s10 = sshll.u32 %s100_s9, 4  ;;  %s14_s10 = int_to_ptr.vmem [resolvable:$true] %s13_s10 }
   0x2   :  { %s86_s11 = scalar_lea.vmem %s14_s10, 256  ;;  %p91_p1 = scmp.lt.s32.totalorder %s14_s10, %s14_s10 }
   0x3   :  { %p87_p0 = scmp.ne.s32.totalorder %s14_s10, %s86_s11  ;;  %p92_p2 = scmp.lt.s32.totalorder %s86_s11, %s86_s11 }
   0x5   :  { %p93_p3 = por %p92_p2, %p91_p1 }
   0x7   :  { %p94_p4 = pnand %p93_p3, %p87_p0 }
   0x9   :  { %97 = shalt.err (!%p94_p4)
}
   0xa   :  { %s101_s12 = smov 128   ;;  %s102_s13 = smov 8  }
   0xb   :  { %19 = dma.hbm_to_vmem [thread:$0]  %s136_s0, 256, %s14_s10, [#allocation3], %s101_s12, %s101_s12, %s102_s13  }
   0xc   :  { %98 = dma.done.wait [#allocation3], 256  }
   0xd   :  { %99 = vsyncadd [#allocation3], 4294967040  ;;  %vm29_vm0 = vcmask 58368   ;;  %v103_v0 = vmov 0.0   ;;  %v31_v1 = vld [vmem:[#allocation2] sm:$0xff]  ;;  %vm43_vm1 = vcmask 261120   ;;  %v52_v8 = vlaneseq }
   0xe   :  { %30 = vst.msk [vmem:[%s138_s2] sm:$0x3] %vm29_vm0, %v103_v0  ;;  %v73_v2 = vld [vmem:[%s137_s1] ss:$0 sm:$0xff]  ;;  %v32_v3 = vld [vmem:[#allocation2 + $0x8] sm:$0xff]  ;;  %vm62_vm2 = vcmask 1041409  }
   0xf   :  { %v40_v4 = vmul.f32 %v73_v2, %v31_v1  ;;  %v41_v5 = vmul.f32 %v73_v2, %v32_v3  ;;  %v53_v9 = vand.u32 127, %v52_v8  ;;  %v55_v10 = vshrl.u32 %v52_v8, 7 }
  0x11   :  { %v44_v6 = vsel %vm43_vm1, %v40_v4, 0.0  ;;  %v47_v7 = vsel %vm43_vm1, %v41_v5, 0.0  ;;  %v56_v12 = vsub.s32 %v53_v9, %v55_v10 }
  0x12   :  { %45 = vadd.xlane.f32.xlu0 %v44_v6 }
  0x15   :  { %v42_v15 = vld [vmem:[%s138_s2] sm:$0x3] }
  0x16   :  { %48 = vadd.xlane.f32.xlu0 %v47_v7 }
  0x9b   :  { %v46_v11 = vpop.xlane.xlu0 %45 }
  0x9c   :  { %v57_v14 = vrot.slane %v46_v11, %v56_v12 }
  0x9f   :  { %v49_v13 = vpop.xlane.xlu0 %48 }
  0xa0   :  { %v61_v16 = vrot.slane %v49_v13, %v56_v12 }
  0xa2   :  { %v63_v17 = vsel %vm62_vm2, %v61_v16, %v57_v14 }
  0xa3   :  { %v65_v18 = vadd.f32 %v63_v17, %v42_v15 }
  0xa5   :  { %67 = vst.msk [vmem:[%s138_s2] sm:$0x3] %vm29_vm0, %v65_v18 }
  0xa6   :  { %72 = vsyncpa [#allocation3], 1 }

</bundles_post_ra>
